<compile_context>
chip_gen: v7x
topology: tpu7x:2x2x1
jax: 0.10.0
libtpu: 0.0.40
codegen_flags: <defaults>
</compile_context>

<pallas_src>
import functools

import jax
import jax.numpy as jnp
from jax.experimental import pallas as pl
from jax.experimental.pallas import tpu as pltpu


def _label_smoothing_kernel(pred_ref, tgt_ref, *rest, smooth_val, delta,
                            n_total, tn, total_blocks, has_weight,
                            need_smooth, has_tail, ragged):
    if has_weight:
        coef_ref, w_ref, out_ref = rest
    else:
        (out_ref,) = rest

    c = pl.program_id(0)            # batch-half index ("parallel"; megacore on v7x)
    i = pl.program_id(1)            # row-tile index within the half ("arbitrary")
    nb = pl.num_programs(1)
    blk = c * nb + i

    # The output block index is constant along axis 1, so out_ref stays
    # resident in VMEM across i and acts as the per-core accumulator.
    @pl.when(i == 0)
    def _():
        out_ref[...] = jnp.zeros_like(out_ref)

    def compute():
        x = pred_ref[...].astype(jnp.float32)                    # (tn, C)

        # Numerically stable log-softmax pieces (logp never materialized).
        m = jnp.max(x, axis=-1, keepdims=True)                   # (tn, 1)
        z = x - m                                                # (tn, C)
        se = jnp.sum(jnp.exp(z), axis=-1, keepdims=True)         # (tn, 1)
        lse = jnp.log(se)                                        # (tn, 1)

        if has_weight:
            wz = z * w_ref[...].astype(jnp.float32)              # (tn, C)
        else:
            wz = z                                               # weight == 1

        # Target-class term via a single lane mask + reduce (no gather).
        cls_ids = jax.lax.broadcasted_iota(jnp.int32, x.shape, 1)
        mask = cls_ids == tgt_ref[...]                           # (tn, C)
        wz_t = jnp.sum(jnp.where(mask, wz, 0.0), axis=-1, keepdims=True)

        # row = lse*coef - smooth_val*sum_c(wz) - delta*wz_t, with
        # coef = smooth_val*sum(w) + delta*w[target] (precomputed per row;
        # identically 1.0 when weight is None).
        if has_weight:
            row = lse * coef_ref[...] - delta * wz_t
        else:
            row = lse - delta * wz_t
        if need_smooth:
            sum_wz = jnp.sum(wz, axis=-1, keepdims=True)
            row = row - smooth_val * sum_wz

        if ragged:
            # Select-based masking: garbage (possibly NaN) padded rows never
            # propagate because jnp.where is a select, not a multiply.
            local = jax.lax.broadcasted_iota(jnp.int32, (tn, 1), 0)
            row = jnp.where(blk * tn + local < n_total, row, 0.0)

        out_ref[...] += row

    if has_tail:
        # Clamped tail tiles (blk >= total_blocks) skip all compute.
        pl.when(blk < total_blocks)(compute)
    else:
        compute()


def label_smoothing_loss(pred, target, *, smoothing=0.0, weight=None,
                         tn=None, num_cores=None):
    """pred: (N, C) float (f32 or bf16), target: (N,) int. Returns scalar f32."""
    N, C = pred.shape
    assert 0.0 <= smoothing < 1.0
    confidence = 1.0 - smoothing
    smooth_val = smoothing / (C - 1) if C > 1 else 0.0
    delta = confidence - smooth_val
    has_weight = weight is not None
    need_smooth = smooth_val != 0.0

    # ---- generation-aware knobs -------------------------------------------
    kind = ""
    try:
        kind = jax.devices()[0].device_kind.lower()
    except Exception:
        pass
    vmem_cap = 128 * 1024 * 1024
    try:
        vmem_cap = int(getattr(pltpu.get_tpu_info(), "vmem_capacity_bytes",
                               vmem_cap))
    except Exception:
        pass
    is_v7 = ("v7" in kind) or ("7x" in kind) or (vmem_cap <= 64 * 1024 * 1024)

    if num_cores is None:
        num_cores = 2 if is_v7 else 1          # 2 TCs on v7x, 1 on v5e/v6e
    budget_bytes = (2 if is_v7 else 4) * 1024 * 1024
    vmem_limit = (32 if is_v7 else 48) * 1024 * 1024

    pred_bytes = jnp.dtype(pred.dtype).itemsize
    row_mult = 16 if pred_bytes < 4 else 8     # bf16 packs 2 rows per sublane

    # ---- row-tile auto-sizing ----------------------------------------------
    if tn is None:
        tn = (budget_bytes // (C * 4)) // row_mult * row_mult
        tn = max(row_mult, min(8192, tn))
        per_core_rows = pl.cdiv(N, max(1, num_cores))
        tn = min(tn, max(row_mult, pl.cdiv(per_core_rows, row_mult) * row_mult))
    assert tn % row_mult == 0, (tn, row_mult)

    # Fail loudly if even this tile cannot fit in VMEM (vocab-scale C).
    # TODO(synk): add a class-axis grid with an online logsumexp for C large
    # enough that a full (tn, C) row tile does not fit in VMEM.
    est_bytes = 2 * tn * C * pred_bytes + 5 * tn * C * 4 + 256 * 1024
    if est_bytes > vmem_limit:
        raise ValueError(
            f"LabelSmoothingLoss tile ({tn}x{C}) needs ~{est_bytes >> 20} MiB "
            f"VMEM > limit {vmem_limit >> 20} MiB; a class-tiled online-LSE "
            f"variant is required for this class count.")

    total_blocks = pl.cdiv(N, tn)
    num_cores = max(1, min(num_cores, total_blocks))
    nb = pl.cdiv(total_blocks, num_cores)      # row tiles per core
    last_blk = total_blocks - 1
    has_tail = num_cores * nb != total_blocks
    ragged = (N % tn) != 0

    if has_tail:
        def row_block(c, i):
            # Clamp so out-of-range tiles re-read the last block (their compute
            # is skipped in-kernel, so the stale data is never used).
            return (jnp.minimum(c * nb + i, last_blk), 0)
    else:
        def row_block(c, i):
            return (c * nb + i, 0)

    target2d = target.reshape(N, 1).astype(jnp.int32)
    inputs = [pred, target2d]
    in_specs = [pl.BlockSpec((tn, C), row_block),
                pl.BlockSpec((tn, 1), row_block)]
    if has_weight:
        w32 = weight.astype(jnp.float32)
        # Per-row lse coefficient: smooth_val*sum(w) + delta*w[target]
        # (hoists sum(w) and the w[target] gather out of the kernel).
        coef2d = (smooth_val * jnp.sum(w32)
                  + delta * w32[target]).reshape(N, 1).astype(jnp.float32)
        inputs += [coef2d, w32.reshape(1, C)]
        in_specs += [pl.BlockSpec((tn, 1), row_block),
                     pl.BlockSpec((1, C), lambda c, i: (0, 0))]

    kernel = functools.partial(
        _label_smoothing_kernel,
        smooth_val=float(smooth_val), delta=float(delta),
        n_total=int(N), tn=int(tn), total_blocks=int(total_blocks),
        has_weight=has_weight, need_smooth=need_smooth,
        has_tail=has_tail, ragged=ragged)

    partial_rows = pl.pallas_call(
        kernel,
        out_shape=jax.ShapeDtypeStruct((num_cores * tn, 1), jnp.float32),
        grid_spec=pltpu.PrefetchScalarGridSpec(
            num_scalar_prefetch=0,
            grid=(num_cores, nb),
            in_specs=in_specs,
            # One (tn, 1) partial-sum block per core == the accumulator.
            out_specs=pl.BlockSpec((tn, 1), lambda c, i: (c, 0)),
        ),
        compiler_params=pltpu.CompilerParams(
            dimension_semantics=("parallel", "arbitrary"),
            vmem_limit_bytes=vmem_limit,
        ),
    )(*inputs)

    # Final reduction + mean in the wrapper (tiny, numerically a tree sum).
    return jnp.sum(partial_rows) / jnp.float32(N)


def _reference(pred, target, *, smoothing, weight):
    logp = jax.nn.log_softmax(pred.astype(jnp.float32), axis=-1)
    if weight is not None:
        logp = logp * weight[None, :]
    N, C = pred.shape
    true_dist = jnp.full((N, C), smoothing / (C - 1) if C > 1 else 0.0,
                         dtype=jnp.float32)
    true_dist = true_dist.at[jnp.arange(N), target].set(1.0 - smoothing)
    return jnp.mean(jnp.sum(-true_dist * logp, axis=-1))


if __name__ == "__main__":
    key = jax.random.PRNGKey(0)
    k1, k2, k3, k4, k5, k6, k7 = jax.random.split(key, 7)

    # Case 1: per-class weights + smoothing > 0 (weighted / smoothed path).
    N1, C1, s1 = 32, 128, 0.1
    pred1 = jax.random.normal(k1, (N1, C1), dtype=jnp.float32)
    tgt1 = jax.random.randint(k2, (N1,), 0, C1, dtype=jnp.int32)
    w1 = 0.5 + jax.random.uniform(k3, (C1,), dtype=jnp.float32)
    out1 = jax.block_until_ready(
        label_smoothing_loss(pred1, tgt1, smoothing=s1, weight=w1))
    ref1 = _reference(pred1, tgt1, smoothing=s1, weight=w1)
    assert jnp.allclose(out1, ref1, rtol=1e-4, atol=1e-4), (out1, ref1)

    # Case 2: ragged batch, no weight, smoothing == 0 (one-hot / NLL fast path).
    N2, C2, s2 = 20, 128, 0.0
    pred2 = jax.random.normal(k4, (N2, C2), dtype=jnp.float32)
    tgt2 = jax.random.randint(k5, (N2,), 0, C2, dtype=jnp.int32)
    out2 = jax.block_until_ready(
        label_smoothing_loss(pred2, tgt2, smoothing=s2, weight=None))
    ref2 = _reference(pred2, tgt2, smoothing=s2, weight=None)
    assert jnp.allclose(out2, ref2, rtol=1e-4, atol=1e-4), (out2, ref2)

    # Case 3: bf16 pred straight from the producer, ragged, smoothing > 0.
    N3, C3, s3 = 37, 256, 0.2
    pred3 = jax.random.normal(k6, (N3, C3), dtype=jnp.float32).astype(jnp.bfloat16)
    tgt3 = jax.random.randint(k7, (N3,), 0, C3, dtype=jnp.int32)
    out3 = jax.block_until_ready(
        label_smoothing_loss(pred3, tgt3, smoothing=s3, weight=None))
    ref3 = _reference(pred3, tgt3, smoothing=s3, weight=None)
    assert jnp.allclose(out3, ref3, rtol=1e-3, atol=1e-3), (out3, ref3)

    print("KERNEL_OK")
</pallas_src>

<mosaic_0001>
module attributes {stable_mosaic.version = 11 : i64} {
  func.func @_label_smoothing_kernel(%arg0: i32, %arg1: i32, %arg2: memref<32x128xf32, #tpu.memory_space<vmem>>, %arg3: memref<32x1xi32, #tpu.memory_space<vmem>>, %arg4: memref<32x1xf32, #tpu.memory_space<vmem>>, %arg5: memref<1x128xf32, #tpu.memory_space<vmem>>, %arg6: memref<32x1xf32, #tpu.memory_space<vmem>>) attributes {dimension_semantics = [#tpu.dimension_semantics<parallel>, #tpu.dimension_semantics<arbitrary>], iteration_bounds = array<i64: 1, 1>, scalar_prefetch = 0 : i64, scratch_operands = 0 : i64, tpu.core_type = #tpu.core_type<tc>, window_params = [{transform_indices = @transform_0, window_bounds = array<i64: 32, 128>}, {transform_indices = @transform_1, window_bounds = array<i64: 32, 1>}, {transform_indices = @transform_2, window_bounds = array<i64: 32, 1>}, {pipeline_mode = #tpu.pipeline_mode<synchronous>, transform_indices = @transform_3, window_bounds = array<i64: 1, 128>}, {transform_indices = @transform_4, window_bounds = array<i64: 32, 1>}]} {
    %c0_i32 = arith.constant 0 : i32
    %0 = arith.cmpi eq, %arg1, %c0_i32 : i32
    %1 = arith.extui %0 : i1 to i32
    %c0_i32_0 = arith.constant 0 : i32
    %2 = arith.cmpi ne, %1, %c0_i32_0 : i32
    scf.if %2 {
      %cst_18 = arith.constant 0.000000e+00 : f32
      %36 = vector.broadcast %cst_18 : f32 to vector<32x1xf32>
      %c0_19 = arith.constant 0 : index
      %c0_20 = arith.constant 0 : index
      %37 = vector.load %arg6[%c0_19, %c0_20] : memref<32x1xf32, #tpu.memory_space<vmem>>, vector<32x1xf32>
      tpu.vector_store %arg6[%c0_19, %c0_20], %36 {strides = array<i32>} : memref<32x1xf32, #tpu.memory_space<vmem>>, vector<32x1xf32>,
    } else {
    }
    %c0 = arith.constant 0 : index
    %c0_1 = arith.constant 0 : index
    %3 = vector.load %arg2[%c0, %c0_1] : memref<32x128xf32, #tpu.memory_space<vmem>>, vector<32x128xf32>
    %cst = arith.constant dense<0xFF800000> : vector<32xf32>
    %4 = vector.multi_reduction <maximumf>, %3, %cst [1] : vector<32x128xf32> to vector<32xf32>
    %5 = vector.shape_cast %4 : vector<32xf32> to vector<32x1xf32>
    %6 = vector.broadcast %5 : vector<32x1xf32> to vector<32x128xf32>
    %7 = arith.subf %3, %6 : vector<32x128xf32>
    %8 = math.exp %7 : vector<32x128xf32>
    %cst_2 = arith.constant dense<0.000000e+00> : vector<32xf32>
    %9 = vector.multi_reduction <add>, %8, %cst_2 [1] : vector<32x128xf32> to vector<32xf32>
    %10 = vector.shape_cast %9 : vector<32xf32> to vector<32x1xf32>
    %11 = math.log %10 : vector<32x1xf32>
    %c0_3 = arith.constant 0 : index
    %c0_4 = arith.constant 0 : index
    %12 = vector.load %arg5[%c0_3, %c0_4] : memref<1x128xf32, #tpu.memory_space<vmem>>, vector<1x128xf32>
    %13 = vector.broadcast %12 : vector<1x128xf32> to vector<32x128xf32>
    %14 = arith.mulf %7, %13 : vector<32x128xf32>
    %15 = tpu.iota {dimensions = array<i32: 1>} : vector<32x128xi32>
    %c0_5 = arith.constant 0 : index
    %c0_6 = arith.constant 0 : index
    %16 = vector.load %arg3[%c0_5, %c0_6] : memref<32x1xi32, #tpu.memory_space<vmem>>, vector<32x1xi32>
    %17 = vector.broadcast %16 : vector<32x1xi32> to vector<32x128xi32>
    %18 = arith.cmpi eq, %15, %17 : vector<32x128xi32>
    %cst_7 = arith.constant 0.000000e+00 : f32
    %19 = vector.broadcast %cst_7 : f32 to vector<32x128xf32>
    %20 = arith.select %18, %14, %19 : vector<32x128xi1>, vector<32x128xf32>
    %cst_8 = arith.constant dense<0.000000e+00> : vector<32xf32>
    %21 = vector.multi_reduction <add>, %20, %cst_8 [1] : vector<32x128xf32> to vector<32xf32>
    %22 = vector.shape_cast %21 : vector<32xf32> to vector<32x1xf32>
    %c0_9 = arith.constant 0 : index
    %c0_10 = arith.constant 0 : index
    %23 = vector.load %arg4[%c0_9, %c0_10] : memref<32x1xf32, #tpu.memory_space<vmem>>, vector<32x1xf32>
    %24 = arith.mulf %11, %23 : vector<32x1xf32>
    %cst_11 = arith.constant 0.899212599 : f32
    %25 = vector.broadcast %cst_11 : f32 to vector<32x1xf32>
    %26 = arith.mulf %25, %22 : vector<32x1xf32>
    %27 = arith.subf %24, %26 : vector<32x1xf32>
    %cst_12 = arith.constant dense<0.000000e+00> : vector<32xf32>
    %28 = vector.multi_reduction <add>, %14, %cst_12 [1] : vector<32x128xf32> to vector<32xf32>
    %29 = vector.shape_cast %28 : vector<32xf32> to vector<32x1xf32>
    %cst_13 = arith.constant 7.87401571E-4 : f32
    %30 = vector.broadcast %cst_13 : f32 to vector<32x1xf32>
    %31 = arith.mulf %30, %29 : vector<32x1xf32>
    %32 = arith.subf %27, %31 : vector<32x1xf32>
    %c0_14 = arith.constant 0 : index
    %c0_15 = arith.constant 0 : index
    %33 = vector.load %arg6[%c0_14, %c0_15] : memref<32x1xf32, #tpu.memory_space<vmem>>, vector<32x1xf32>
    %34 = arith.addf %33, %32 : vector<32x1xf32>
    %c0_16 = arith.constant 0 : index
    %c0_17 = arith.constant 0 : index
    %35 = vector.load %arg6[%c0_16, %c0_17] : memref<32x1xf32, #tpu.memory_space<vmem>>, vector<32x1xf32>
    tpu.vector_store %arg6[%c0_16, %c0_17], %34 {strides = array<i32>} : memref<32x1xf32, #tpu.memory_space<vmem>>, vector<32x1xf32>,
    return
  }
  func.func @transform_0(%arg0: i32, %arg1: i32) -> (i32, i32) {
    %c1_i32 = arith.constant 1 : i32
    %0 = arith.muli %arg0, %c1_i32 : i32
    %1 = arith.addi %0, %arg1 : i32
    %c0_i32 = arith.constant 0 : i32
    %c0_i32_0 = arith.constant 0 : i32
    return %1, %c0_i32 : i32, i32
  }
  func.func @transform_1(%arg0: i32, %arg1: i32) -> (i32, i32) {
    %c1_i32 = arith.constant 1 : i32
    %0 = arith.muli %arg0, %c1_i32 : i32
    %1 = arith.addi %0, %arg1 : i32
    %c0_i32 = arith.constant 0 : i32
    %c0_i32_0 = arith.constant 0 : i32
    return %1, %c0_i32 : i32, i32
  }
  func.func @transform_2(%arg0: i32, %arg1: i32) -> (i32, i32) {
    %c1_i32 = arith.constant 1 : i32
    %0 = arith.muli %arg0, %c1_i32 : i32
    %1 = arith.addi %0, %arg1 : i32
    %c0_i32 = arith.constant 0 : i32
    %c0_i32_0 = arith.constant 0 : i32
    return %1, %c0_i32 : i32, i32
  }
  func.func @transform_3(%arg0: i32, %arg1: i32) -> (i32, i32) {
    %c0_i32 = arith.constant 0 : i32
    %c0_i32_0 = arith.constant 0 : i32
    %c0_i32_1 = arith.constant 0 : i32
    return %c0_i32, %c0_i32_0 : i32, i32
  }
  func.func @transform_4(%arg0: i32, %arg1: i32) -> (i32, i32) {
    %c0_i32 = arith.constant 0 : i32
    %c0_i32_0 = arith.constant 0 : i32
    return %arg0, %c0_i32 : i32, i32
  }
}

</mosaic_0001>

<bundles_post_ra>
// kernel: tpu_custom_call.1
= control target key start
LH: loop header
LB: loop body
LE: loop exit
PB: predicated region body
PF: predicated region fallthrough
CT: control target
= control target key end

     0   :  { %v265_v2 = vmov 0   ;;  %v143_v20 = vlaneseq  ;;  %vm87_vm4 = vcmask 7168   ;;  %v266_v40 = vmov 0.0   ;;  %s375_s0 = inlined_call_operand.vmem [shape: f32[32,128], index: 0, kind: input, shape index: {}]   ;;  %s376_s1 = inlined_call_operand.vmem [shape: s32[32,1], index: 1, kind: input, shape index: {}]   ;;  %s377_s3 = inlined_call_operand.vmem [shape: f32[1,128], index: 3, kind: input, shape index: {}]   ;;  %s378_s4 = inlined_call_operand.vmem [shape: f32[32,1], index: 4, kind: output, shape index: {}]   ;;  %s379_s2 = inlined_call_operand.vmem [shape: f32[32,1], index: 2, kind: input, shape index: {}]  }
   0x1   :  { %v94_v0 = vld [vmem:[%s375_s0 + $0x10] sm:$0xff]  ;;  %v92_v1 = vld [vmem:[%s375_s0] sm:$0xff]  ;;  %248 = vset.pattern.permute.xlu1 %v265_v2  ;;  %247 = vset.pattern.permute.xlu0 %v265_v2  ;;  %v95_v3 = vld [vmem:[%s375_s0 + $0x18] sm:$0xff]  ;;  %88 = vst.msk [vmem:[%s378_s4] sm:$0xff] %vm87_vm4, %v266_v40 }
   0x2   :  { %100 = vmax.xlane.f32.xlu1 %v94_v0  ;;  %96 = vmax.xlane.f32.xlu0 %v92_v1  ;;  %v93_v4 = vld [vmem:[%s375_s0 + $0x8] sm:$0xff]  ;;  %v147_v6 = vld [vmem:[%s376_s1 + $0x10] sm:$0xff]  ;;  %v145_v7 = vld [vmem:[%s376_s1] sm:$0xff]  ;;  %v144_v23 = vand.u32 127, %v143_v20  ;;  %89 = vst.msk [vmem:[%s378_s4 + $0x8] sm:$0xff] %vm87_vm4, %v266_v40 }
   0x3   :  { %v146_v5 = vld [vmem:[%s376_s1 + $0x8] sm:$0xff]  ;;  %v148_v8 = vld [vmem:[%s376_s1 + $0x18] sm:$0xff]  ;;  %v244_v25 = vld [vmem:[%s377_s3] ss:$0 sm:$0xff]  ;;  %90 = vst.msk [vmem:[%s378_s4 + $0x10] sm:$0xff] %vm87_vm4, %v266_v40 }
   0x4   :  { %91 = vst.msk [vmem:[%s378_s4 + $0x18] sm:$0xff] %vm87_vm4, %v266_v40  ;;  %v177_v47 = vld [vmem:[%s379_s2] sm:$0xff]  ;;  %v178_v60 = vld [vmem:[%s379_s2 + $0x8] sm:$0xff]  ;;  %v179_v62 = vld [vmem:[%s379_s2 + $0x10] sm:$0xff] }
   0x6   :  { %102 = vmax.xlane.f32.xlu1 %v95_v3  ;;  %98 = vmax.xlane.f32.xlu0 %v93_v4 }
   0x8   :  { %v209_v58 = vld [vmem:[%s378_s4] sm:$0xff] }
  0x17   :  { %153 = vperm.xlu1 %248, %v146_v5  }
  0x1b   :  { %156 = vperm.xlu1 %248, %v147_v6  }
  0x1c   :  { %150 = vperm.xlu0 %247, %v145_v7  }
  0x1f   :  { %159 = vperm.xlu1 %248, %v148_v8   ;;  %v180_v8 = vld [vmem:[%s379_s2 + $0x18] sm:$0xff] }
  0x8f   :  { %v101_v9 = vpop.xlane.xlu1 %100  ;;  %v97_v10 = vpop.xlane.xlu0 %96 }
  0x90   :  { %v104_v11 = vsub.f32 %v92_v1, %v97_v10  ;;  %v106_v13 = vsub.f32 %v94_v0, %v101_v9 }
  0x92   :  { %v108_v12 = vmul.f32 1.442695, %v104_v11  ;;  %v112_v18 = vmul.f32 1.442695, %v106_v13  ;;  %v139_v28 = vmul.f32 %v244_v25, %v104_v11  ;;  %v141_v31 = vmul.f32 %v244_v25, %v106_v13 }
  0x93   :  { %v99_v14 = vpop.xlane.xlu0 %98  ;;  %v103_v16 = vpop.xlane.xlu1 %102 }
  0x94   :  { %v105_v15 = vsub.f32 %v93_v4, %v99_v14  ;;  %249 = vpow2.f32 %v108_v12  ;;  %v107_v19 = vsub.f32 %v95_v3, %v103_v16  ;;  %v211_v14 = vld [vmem:[%s378_s4 + $0x10] sm:$0xff] }
  0x96   :  { %v110_v17 = vmul.f32 1.442695, %v105_v15  ;;  %v114_v21 = vmul.f32 1.442695, %v107_v19  ;;  %v140_v35 = vmul.f32 %v244_v25, %v105_v15  ;;  %v142_v38 = vmul.f32 %v244_v25, %v107_v19  ;;  %v210_v19 = vld [vmem:[%s378_s4 + $0x8] sm:$0xff] }
  0x97   :  { %v154_v22 = vpop.permute.xlu1 %153 }
  0x98   :  { %251 = vpow2.f32 %v110_v17  ;;  %vm162_vm2 = vcmp.eq.s32.totalorder %v144_v23, %v154_v22 }
  0x99   :  { %253 = vpow2.f32 %v112_v18  ;;  %v166_v37 = vsel %vm162_vm2, %v140_v35, 0.0 }
  0x9a   :  { %255 = vpow2.f32 %v114_v21 }
  0x9b   :  { %v151_v24 = vpop.permute.xlu0 %150  ;;  %v157_v27 = vpop.permute.xlu1 %156 }
  0x9c   :  { %vm161_vm0 = vcmp.eq.s32.totalorder %v144_v23, %v151_v24  ;;  %vm163_vm1 = vcmp.eq.s32.totalorder %v144_v23, %v157_v27 }
  0x9d   :  { %v165_v30 = vsel %vm161_vm0, %v139_v28, 0.0  ;;  %v167_v33 = vsel %vm163_vm1, %v141_v31, 0.0 }
  0x9e   :  { %v250_v26 = vpop.eup %249 }
  0x9f   :  { %116 = vadd.xlane.f32.xlu1 %v250_v26  ;;  %v160_v36 = vpop.permute.xlu1 %159  ;;  %v212_v26 = vld [vmem:[%s378_s4 + $0x18] sm:$0xff] }
  0xa0   :  { %vm164_vm3 = vcmp.eq.s32.totalorder %v144_v23, %v160_v36 }
  0xa1   :  { %v168_v39 = vsel %vm164_vm3, %v142_v38, 0.0 }
  0xa2   :  { %v252_v29 = vpop.eup %251 }
  0xa3   :  { %118 = vadd.xlane.f32.xlu0 %v252_v29  ;;  %169 = vadd.xlane.f32.xlu1 %v165_v30  ;;  %v254_v32 = vpop.eup %253 }
  0xa4   :  { %v256_v34 = vpop.eup %255 }
  0xa7   :  { %173 = vadd.xlane.f32.xlu0 %v167_v33  ;;  %120 = vadd.xlane.f32.xlu1 %v254_v32 }
  0xab   :  { %193 = vadd.xlane.f32.xlu0 %v139_v28  ;;  %122 = vadd.xlane.f32.xlu1 %v256_v34 }
  0xaf   :  { %197 = vadd.xlane.f32.xlu0 %v141_v31  ;;  %171 = vadd.xlane.f32.xlu1 %v166_v37 }
  0xb3   :  { %175 = vadd.xlane.f32.xlu1 %v168_v39 }
  0xb7   :  { %195 = vadd.xlane.f32.xlu1 %v140_v35 }
  0xbb   :  { %199 = vadd.xlane.f32.xlu1 %v142_v38 }
 0x12c   :  { %v117_v41 = vpop.xlane.xlu1 %116 }
 0x12d   :  { %257 = vlog2.f32 %v117_v41 }
 0x130   :  { %v170_v42 = vpop.xlane.xlu1 %169  ;;  %v119_v43 = vpop.xlane.xlu0 %118 }
 0x131   :  { %259 = vlog2.f32 %v119_v43  ;;  %v185_v52 = vmul.f32 0.8992126, %v170_v42 }
 0x134   :  { %v121_v44 = vpop.xlane.xlu1 %120  ;;  %v174_v45 = vpop.xlane.xlu0 %173 }
 0x135   :  { %261 = vlog2.f32 %v121_v44  ;;  %v187_v6 = vmul.f32 0.8992126, %v174_v45 }
 0x137   :  { %v258_v46 = vpop.eup %257 }
 0x138   :  { %v125_v48 = vmul.f32 0.6931472, %v258_v46  ;;  %v123_v49 = vpop.xlane.xlu1 %122  ;;  %v194_v50 = vpop.xlane.xlu0 %193 }
 0x139   :  { %263 = vlog2.f32 %v123_v49  ;;  %v201_v55 = vmul.f32 0.0007874016, %v194_v50 }
 0x13a   :  { %v181_v51 = vmul.f32 %v177_v47, %v125_v48 }
 0x13b   :  { %v260_v53 = vpop.eup %259 }
 0x13c   :  { %v189_v54 = vsub.f32 %v181_v51, %v185_v52  ;;  %v172_v56 = vpop.xlane.xlu1 %171  ;;  %v127_v57 = vmul.f32 0.6931472, %v260_v53  ;;  %v198_v4 = vpop.xlane.xlu0 %197 }
 0x13d   :  { %v186_v3 = vmul.f32 0.8992126, %v172_v56  ;;  %v203_v11 = vmul.f32 0.0007874016, %v198_v4 }
 0x13e   :  { %v205_v59 = vsub.f32 %v189_v54, %v201_v55  ;;  %v182_v2 = vmul.f32 %v178_v60, %v127_v57 }
 0x13f   :  { %v262_v61 = vpop.eup %261 }
 0x140   :  { %v129_v63 = vmul.f32 0.6931472, %v262_v61  ;;  %v213_v0 = vadd.f32 %v209_v58, %v205_v59  ;;  %v176_v1 = vpop.xlane.xlu1 %175  ;;  %v190_v13 = vsub.f32 %v182_v2, %v186_v3 }
 0x141   :  { %v188_v18 = vmul.f32 0.8992126, %v176_v1 }
 0x142   :  { %v183_v5 = vmul.f32 %v179_v62, %v129_v63  ;;  %218 = vst.msk [vmem:[%s378_s4] sm:$0xff] %vm87_vm4, %v213_v0 }
 0x143   :  { %v264_v7 = vpop.eup %263 }
 0x144   :  { %v191_v9 = vsub.f32 %v183_v5, %v187_v6  ;;  %v131_v10 = vmul.f32 0.6931472, %v264_v7  ;;  %v196_v12 = vpop.xlane.xlu1 %195 }
 0x145   :  { %v202_v15 = vmul.f32 0.0007874016, %v196_v12 }
 0x146   :  { %v207_v16 = vsub.f32 %v191_v9, %v203_v11  ;;  %v184_v17 = vmul.f32 %v180_v8, %v131_v10 }
 0x147   :  { %v206_v20 = vsub.f32 %v190_v13, %v202_v15 }
 0x148   :  { %v215_v21 = vadd.f32 %v211_v14, %v207_v16  ;;  %v192_v22 = vsub.f32 %v184_v17, %v188_v18  ;;  %v200_v23 = vpop.xlane.xlu1 %199 }
 0x149   :  { %v214_v24 = vadd.f32 %v210_v19, %v206_v20  ;;  %v204_v25 = vmul.f32 0.0007874016, %v200_v23 }
 0x14a   :  { %220 = vst.msk [vmem:[%s378_s4 + $0x10] sm:$0xff] %vm87_vm4, %v215_v21 }
 0x14b   :  { %219 = vst.msk [vmem:[%s378_s4 + $0x8] sm:$0xff] %vm87_vm4, %v214_v24  ;;  %v208_v27 = vsub.f32 %v192_v22, %v204_v25 }
 0x14d   :  { %v216_v28 = vadd.f32 %v212_v26, %v208_v27 }
 0x14f   :  { %221 = vst.msk [vmem:[%s378_s4 + $0x18] sm:$0xff] %vm87_vm4, %v216_v28 }

</bundles_post_ra>
